<compile_context>
chip_gen: v5e
topology: v5e:2x2
jax: 0.10.0
libtpu: 0.0.40
codegen_flags: <defaults>
</compile_context>

<pallas_src>
import functools

import jax
import jax.numpy as jnp
from jax import lax
from jax.experimental import pallas as pl
from jax.experimental.pallas import tpu as pltpu


def _cdiv(a: int, b: int) -> int:
    return -(-a // b)


def _round_up(n: int, m: int) -> int:
    return ((n + m - 1) // m) * m


@functools.lru_cache(maxsize=None)
def _vmem_limit_bytes() -> int:
    # Generation-aware scoped-VMEM limit: 3/4 of physical VMEM, clamped.
    cap = 128 * 1024 * 1024
    try:
        info = pltpu.get_tpu_info()
        cap = int(getattr(info, "vmem_capacity_bytes", cap))
    except Exception:
        pass
    return int(min(max(cap * 3 // 4, 32 * 1024 * 1024), 96 * 1024 * 1024))


def _cost(b, in_dim, out_dim):
    return pl.CostEstimate(
        flops=2 * b * in_dim * out_dim,
        transcendentals=0,
        bytes_accessed=4 * (b * in_dim + in_dim * out_dim + out_dim + b * out_dim),
    )


# ----------------------------------------------------------------------------
# Tiny-out path (out_dim < 128, e.g. the module default 3 -> 1).
# x is read in natural (tb, in_dim) layout; the relayout to a lane-dense
# (out_dim, tb) output happens in-kernel via an NT dot_general (MXU).
# ----------------------------------------------------------------------------
def _linear_small_kernel(x_ref, w_ref, b_ref, oT_ref):
    # x_ref : (tb, in_dim)      natural batch-major block (contiguous in HBM)
    # w_ref : (out_dim, in_dim) full weight, resident
    # b_ref : (out_dim, 1)      bias column
    # oT_ref: (out_dim, tb)     lane-dense output (y transposed)
    yT = lax.dot_general(
        w_ref[...], x_ref[...],
        dimension_numbers=(((1,), (1,)), ((), ())),   # contract both on in_dim
        preferred_element_type=jnp.float32)           # (out_dim, tb)
    oT_ref[...] = (yT + b_ref[...]).astype(oT_ref.dtype)


def _forward_small(x, weight, bias):
    b, in_dim = x.shape
    out_dim = weight.shape[0]

    # Batch tile: as big as comfortably fits double-buffered in VMEM, capped at
    # 4096 lanes (per review: 512 made the kernel pure per-step overhead).
    x_block_budget = 12 * 1024 * 1024
    tb_cap = min(4096, (x_block_budget // (2 * 4 * max(in_dim, 1))) // 128 * 128)
    tb_cap = max(128, tb_cap)

    n_steps = max(1, _cdiv(b, tb_cap))
    tb = _round_up(_cdiv(b, n_steps), 128)
    # v7x megacore: make sure the "parallel" batch axis has >= 2 steps when
    # there is enough work to split (no-op on v5e/v6e).
    if n_steps == 1 and tb >= 1024:
        n_steps = 2
        tb = _round_up(_cdiv(b, 2), 128)
    b_pad = n_steps * tb

    # Pad only when the batch is not already tile-aligned (zero pad rows are
    # computed into lanes that are sliced away below).
    x_p = x if b_pad == b else jnp.pad(x, ((0, b_pad - b), (0, 0)))
    w2 = weight.astype(x.dtype)
    b2 = bias.reshape(out_dim, 1).astype(jnp.float32)

    o_t = pl.pallas_call(
        _linear_small_kernel,
        out_shape=jax.ShapeDtypeStruct((out_dim, b_pad), x.dtype),
        grid=(n_steps,),
        in_specs=[
            pl.BlockSpec((tb, in_dim), lambda i: (i, 0)),          # x batch tile
            pl.BlockSpec((out_dim, in_dim), lambda i: (0, 0)),     # weight (resident)
            pl.BlockSpec((out_dim, 1), lambda i: (0, 0)),          # bias (resident)
        ],
        out_specs=pl.BlockSpec((out_dim, tb), lambda i: (0, i)),
        compiler_params=pltpu.CompilerParams(
            dimension_semantics=("parallel",),
            vmem_limit_bytes=_vmem_limit_bytes()),
        cost_estimate=_cost(b, in_dim, out_dim),
    )(x_p, w2, b2)

    o_t = o_t if b_pad == b else o_t[:, :b]
    # Layout plumbing only: (out_dim, B) -> (B, out_dim); a reshape for out_dim==1.
    return o_t.T


# ----------------------------------------------------------------------------
# Generalized path: M/N/K-tiled MXU matmul with an f32 accumulator.
# ----------------------------------------------------------------------------
def _linear_mxu_kernel(x_ref, w_ref, b_ref, o_ref, acc_ref):
    # x_ref: (tm, tk); w_ref: (tn, tk) natural (out, in) layout; b_ref: (1, tn)
    k = pl.program_id(2)

    @pl.when(k == 0)
    def _init():
        acc_ref[...] = jnp.zeros_like(acc_ref)

    acc_ref[...] += lax.dot_general(
        x_ref[...], w_ref[...],
        dimension_numbers=(((1,), (1,)), ((), ())),   # x @ W.T without a transpose op
        preferred_element_type=jnp.float32)

    @pl.when(k == pl.num_programs(2) - 1)
    def _finalize():
        o_ref[...] = (acc_ref[...] + b_ref[...]).astype(o_ref.dtype)


def _forward_mxu(x, weight, bias):
    m, in_dim = x.shape
    out_dim = weight.shape[0]

    # K tile: full in_dim when it fits (no wrapper pad, single K step); otherwise
    # 2048-wide K tiles with an explicit zero pad (zeros contribute nothing, so
    # partial-K garbage can never leak into the accumulator).
    if in_dim <= 2048:
        tk, k_pad = in_dim, in_dim
    else:
        tk = 2048
        k_pad = _round_up(in_dim, tk)

    # 256-aligned M/N tiles (512) for the 256x256 MXUs on v6e/v7x; small dims
    # use the full extent (always a legal block shape).
    tm = m if m <= 512 else 512
    tn = out_dim if out_dim <= 512 else 512
    m_steps = _cdiv(m, tm)
    n_steps = _cdiv(out_dim, tn)
    # v7x megacore: give the "parallel" axes >= 2 steps when there is work.
    if m_steps * n_steps == 1 and m >= 512:
        tm = 256
        m_steps = _cdiv(m, tm)
    k_steps = k_pad // tk

    x_p = x if k_pad == in_dim else jnp.pad(x, ((0, 0), (0, k_pad - in_dim)))
    w_p = weight if k_pad == in_dim else jnp.pad(weight, ((0, 0), (0, k_pad - in_dim)))
    w_p = w_p.astype(x.dtype)
    b2 = bias.reshape(1, out_dim).astype(jnp.float32)

    return pl.pallas_call(
        _linear_mxu_kernel,
        out_shape=jax.ShapeDtypeStruct((m, out_dim), x.dtype),
        grid=(m_steps, n_steps, k_steps),
        in_specs=[
            pl.BlockSpec((tm, tk), lambda i, j, k: (i, k)),
            pl.BlockSpec((tn, tk), lambda i, j, k: (j, k)),   # W in natural (out, in) layout
            pl.BlockSpec((1, tn), lambda i, j, k: (0, j)),
        ],
        out_specs=pl.BlockSpec((tm, tn), lambda i, j, k: (i, j)),
        scratch_shapes=[pltpu.VMEM((tm, tn), jnp.float32)],
        compiler_params=pltpu.CompilerParams(
            dimension_semantics=("parallel", "parallel", "arbitrary"),
            vmem_limit_bytes=_vmem_limit_bytes()),
        cost_estimate=_cost(m, in_dim, out_dim),
    )(x_p, w_p, b2)


def linear_regression_forward(x, weight, bias):
    """y = x @ weight.T + bias  (torch.nn.Linear forward semantics).

    x: (..., in_dim); weight: (out_dim, in_dim); bias: (out_dim,).
    """
    in_dim = x.shape[-1]
    out_dim = weight.shape[0]
    lead = x.shape[:-1]
    x2 = x.reshape(-1, in_dim)

    if out_dim < 128 and in_dim <= 2048:
        y2 = _forward_small(x2, weight, bias)
    else:
        y2 = _forward_mxu(x2, weight, bias)
    return y2.reshape(*lead, out_dim)


if __name__ == "__main__":
    input_dim, output_dim = 3, 1
    batch = 8

    key = jax.random.PRNGKey(0)
    kx, kb, kw = jax.random.split(key, 3)

    # Snap inputs to bf16-exact f32 values so the checks don't depend on the
    # MXU's f32 multi-pass policy (products are then exact in f32 accumulation).
    def _snap(a):
        return a.astype(jnp.bfloat16).astype(jnp.float32)

    x = _snap(jax.random.normal(kx, (batch, input_dim), dtype=jnp.float32))

    # Module-default init: weight -> zeros (nn.init.zeros_), bias -> torch-style uniform.
    bound = 1.0 / (input_dim ** 0.5)
    bias = _snap(jax.random.uniform(kb, (output_dim,), dtype=jnp.float32,
                                    minval=-bound, maxval=bound))
    w_zero = jnp.zeros((output_dim, input_dim), dtype=jnp.float32)

    y0 = linear_regression_forward(x, w_zero, bias)
    jax.block_until_ready(y0)
    assert y0.shape == (batch, output_dim)
    assert jnp.allclose(y0, x @ w_zero.T + bias[None, :], atol=1e-6)

    # Non-zero weights so the dot/relayout path is actually validated.
    w_rand = _snap(jax.random.normal(kw, (output_dim, input_dim), dtype=jnp.float32))
    y1 = linear_regression_forward(x, w_rand, bias)
    jax.block_until_ready(y1)
    assert jnp.allclose(y1, x @ w_rand.T + bias[None, :], atol=1e-4, rtol=1e-4)

    # Exercise the generalized M/N/K-tiled MXU path at a modest shape
    # (out_dim = 128 routes to the MXU path; M splits into 2 parallel steps).
    bm, km, nm = 512, 256, 128
    xm = _snap(jax.random.normal(kx, (bm, km), dtype=jnp.float32))
    wm = _snap(jax.random.normal(kw, (nm, km), dtype=jnp.float32) / (km ** 0.5))
    bmv = _snap(jax.random.normal(kb, (nm,), dtype=jnp.float32))
    ym = linear_regression_forward(xm, wm, bmv)
    jax.block_until_ready(ym)
    assert ym.shape == (bm, nm)
    assert jnp.allclose(ym, xm @ wm.T + bmv[None, :], atol=1e-3, rtol=1e-3)

    print("KERNEL_OK")
</pallas_src>

<mosaic_0001>
module attributes {stable_mosaic.version = 11 : i64} {
  func.func @_linear_small_kernel(%arg0: i32, %arg1: memref<128x3xf32, #tpu.memory_space<vmem>>, %arg2: memref<1x3xf32, #tpu.memory_space<vmem>>, %arg3: memref<1x1xf32, #tpu.memory_space<vmem>>, %arg4: memref<1x128xf32, #tpu.memory_space<vmem>>) attributes {dimension_semantics = [#tpu.dimension_semantics<parallel>], iteration_bounds = array<i64: 1>, scalar_prefetch = 0 : i64, scratch_operands = 0 : i64, tpu.core_type = #tpu.core_type<tc>, window_params = [{transform_indices = @transform_0, window_bounds = array<i64: 128, 3>}, {pipeline_mode = #tpu.pipeline_mode<synchronous>, transform_indices = @transform_1, window_bounds = array<i64: 1, 3>}, {pipeline_mode = #tpu.pipeline_mode<synchronous>, transform_indices = @transform_2, window_bounds = array<i64: 1, 1>}, {transform_indices = @transform_3, window_bounds = array<i64: 1, 128>}]} {
    %c0 = arith.constant 0 : index
    %c0_0 = arith.constant 0 : index
    %0 = vector.load %arg2[%c0, %c0_0] : memref<1x3xf32, #tpu.memory_space<vmem>>, vector<1x3xf32>
    %c0_1 = arith.constant 0 : index
    %c0_2 = arith.constant 0 : index
    %1 = vector.load %arg1[%c0_1, %c0_2] : memref<128x3xf32, #tpu.memory_space<vmem>>, vector<128x3xf32>
    %cst = arith.constant dense<0.000000e+00> : vector<1x128xf32>
    %2 = tpu.matmul %0, %1, %cst {dimension_numbers = #tpu.dot_dimension_numbers<[1], [1], [0], [0], [0, 0, 1, 0], [], []>} : vector<1x3xf32>, vector<128x3xf32>, vector<1x128xf32> -> vector<1x128xf32>
    %c0_3 = arith.constant 0 : index
    %c0_4 = arith.constant 0 : index
    %3 = vector.load %arg3[%c0_3, %c0_4] : memref<1x1xf32, #tpu.memory_space<vmem>>, vector<1x1xf32>
    %4 = vector.broadcast %3 : vector<1x1xf32> to vector<1x128xf32>
    %5 = arith.addf %2, %4 : vector<1x128xf32>
    %c0_5 = arith.constant 0 : index
    %c0_6 = arith.constant 0 : index
    %6 = vector.load %arg4[%c0_5, %c0_6] : memref<1x128xf32, #tpu.memory_space<vmem>>, vector<1x128xf32>
    tpu.vector_store %arg4[%c0_5, %c0_6], %5 {strides = array<i32>} : memref<1x128xf32, #tpu.memory_space<vmem>>, vector<1x128xf32>,
    return
  }
  func.func @transform_0(%arg0: i32) -> (i32, i32) {
    %c0_i32 = arith.constant 0 : i32
    %c0_i32_0 = arith.constant 0 : i32
    return %arg0, %c0_i32 : i32, i32
  }
  func.func @transform_1(%arg0: i32) -> (i32, i32) {
    %c0_i32 = arith.constant 0 : i32
    %c0_i32_0 = arith.constant 0 : i32
    %c0_i32_1 = arith.constant 0 : i32
    return %c0_i32, %c0_i32_0 : i32, i32
  }
  func.func @transform_2(%arg0: i32) -> (i32, i32) {
    %c0_i32 = arith.constant 0 : i32
    %c0_i32_0 = arith.constant 0 : i32
    %c0_i32_1 = arith.constant 0 : i32
    return %c0_i32, %c0_i32_0 : i32, i32
  }
  func.func @transform_3(%arg0: i32) -> (i32, i32) {
    %c0_i32 = arith.constant 0 : i32
    %c0_i32_0 = arith.constant 0 : i32
    return %c0_i32, %arg0 : i32, i32
  }
}

</mosaic_0001>

<bundles_post_ra>
// kernel: tpu_custom_call.1
= control target key start
LH: loop header
LB: loop body
LE: loop exit
PB: predicated region body
PF: predicated region fallthrough
CT: control target
= control target key end

     0   :  { %s272_s0 = inlined_call_operand.vmem [shape: f32[128,3], index: 0, kind: input, shape index: {}]   ;;  %s273_s1 = inlined_call_operand.vmem [shape: f32[1,3], index: 1, kind: input, shape index: {}]   ;;  %s274_s2 = inlined_call_operand.<no memory space> [shape: f32[1,1], index: 2, kind: input, shape index: {}]   ;;  %s275_s3 = inlined_call_operand.hbm [shape: f32[1,128], index: 3, kind: output, shape index: {}]  }
   0x1   :  { %v8_v0 = vstv %s274_s2 }
   0x2   :  { %9 = vst [vmem:[#allocation2] sm:$0x1] %v8_v0 }
   0x3   :  { %v33_v1 = vld [vmem:[%s272_s0 + $0x78] sm:$0xff]  ;;  %vm41_vm0 = vcmask 23552   ;;  %v32_v2 = vld [vmem:[%s272_s0 + $0x70] sm:$0xff] }
   0x4   :  { %130 = vmatpush.xpose.msk.msra.mxu0 %vm41_vm0, %v33_v1 }
   0x5   :  { %10 = vsyncpa [#allocation4], 0  ;;  %v31_v3 = vld [vmem:[%s272_s0 + $0x68] sm:$0xff]  ;;  %v30_v4 = vld [vmem:[%s272_s0 + $0x60] sm:$0xff]  ;;  %v176_v11 = vmov 0   ;;  %s177_s2 = smov [#allocation3]  }
   0x6   :  { %v29_v5 = vld [vmem:[%s272_s0 + $0x58] sm:$0xff]  ;;  %v28_v6 = vld [vmem:[%s272_s0 + $0x50] sm:$0xff]  ;;  %v27_v7 = vld [vmem:[%s272_s0 + $0x48] sm:$0xff]  ;;  %149 = vset.pattern.permute.xlu0 %v176_v11  ;;  %s119_s20 = sshll.u32 %s177_s2, 4  ;;  %s121_s23 = sshll.u32 %s275_s3, 4  ;;  %s120_s20 = int_to_ptr.vmem [resolvable:$true] %s119_s20  ;;  %s122_s23 = int_to_ptr.hbm [resolvable:$true] %s121_s23 }
   0x7   :  { %v26_v8 = vld [vmem:[%s272_s0 + $0x40] sm:$0xff]  ;;  %v25_v9 = vld [vmem:[%s272_s0 + $0x38] sm:$0xff]  ;;  %v24_v12 = vld [vmem:[%s272_s0 + $0x30] sm:$0xff] }
   0x8   :  { %131 = vmatpush.xpose.msk.msra.mxu0 %vm41_vm0, %v32_v2  ;;  %v23_v13 = vld [vmem:[%s272_s0 + $0x28] sm:$0xff]  ;;  %v22_v14 = vld [vmem:[%s272_s0 + $0x20] sm:$0xff]  ;;  %v21_v15 = vld [vmem:[%s272_s0 + $0x18] sm:$0xff] }
   0x9   :  { %v34_v10 = vld [vmem:[#allocation2] sm:$0x1]  ;;  %v20_v16 = vld [vmem:[%s272_s0 + $0x10] sm:$0xff]  ;;  %v19_v17 = vld [vmem:[%s272_s0 + $0x8] sm:$0xff] }
   0xa   :  { %37 = vperm.xlu0 %149, %v34_v10   ;;  %v18_v18 = vld [vmem:[%s272_s0] sm:$0xff] }
   0xb   :  { %v17_v19 = vld [vmem:[%s273_s1] sm:$0x1] }
   0xc   :  { %132 = vmatpush.xpose.msk.msra.mxu0 %vm41_vm0, %v31_v3 }
  0x10   :  { %133 = vmatpush.xpose.msk.msra.mxu0 %vm41_vm0, %v30_v4 }
  0x14   :  { %134 = vmatpush.xpose.msk.msra.mxu0 %vm41_vm0, %v29_v5 }
  0x18   :  { %135 = vmatpush.xpose.msk.msra.mxu0 %vm41_vm0, %v28_v6 }
  0x1c   :  { %136 = vmatpush.xpose.msk.msra.mxu0 %vm41_vm0, %v27_v7 }
  0x20   :  { %137 = vmatpush.xpose.msk.msra.mxu0 %vm41_vm0, %v26_v8 }
  0x24   :  { %138 = vmatpush.xpose.msk.msra.mxu0 %vm41_vm0, %v25_v9 }
  0x28   :  { %139 = vmatpush.xpose.msk.msra.mxu0 %vm41_vm0, %v24_v12 }
  0x2c   :  { %140 = vmatpush.xpose.msk.msra.mxu0 %vm41_vm0, %v23_v13 }
  0x30   :  { %141 = vmatpush.xpose.msk.msra.mxu0 %vm41_vm0, %v22_v14 }
  0x34   :  { %142 = vmatpush.xpose.msk.msra.mxu0 %vm41_vm0, %v21_v15 }
  0x38   :  { %143 = vmatpush.xpose.msk.msra.mxu0 %vm41_vm0, %v20_v16 }
  0x3c   :  { %144 = vmatpush.xpose.msk.msra.mxu0 %vm41_vm0, %v19_v17 }
  0x40   :  { %145 = vmatpush.xpose.msk.msra.mxu0 %vm41_vm0, %v18_v18 }
  0x43   :  { %146 = vmatmul.msk.f32.vlgmr.msra.gmra.mxu0 %vm41_vm0, %v17_v19 }
  0x7c   :  { %v38_v20 = vpop.permute.xlu0 %37 }
  0x7d   :  { %v40_v21 = vperm.slane %v38_v20, 0 }
  0xc0   :  { %v110_v22 = vpop.f32.mrf.mxu0 }
  0xc1   :  { %v111_v23 = vadd.f32 %v110_v22, %v40_v21 }
  0xc3   :  { %113 = vst [vmem:[#allocation3] sm:$0x1] %v111_v23 }
  0xc4   :  { %124 = dma.vmem_to_hbm [thread:$0]  %s120_s20, 16, %s122_s23, [#allocation4]  }
  0xc5   :  { %174 = dma.done.wait [#allocation4], 16  }
  0xc6   :  { %175 = vsyncadd [#allocation4], 4294967280 }
  0xc7   :  { %129 = vsyncpa [#allocation4], 1 }

</bundles_post_ra>
